<compile_context>
chip_gen: v7x
topology: tpu7x:2x2x1
jax: 0.10.0
libtpu: 0.0.40
codegen_flags: <defaults>
</compile_context>

<pallas_src>
import jax
import jax.numpy as jnp
from jax.experimental import pallas as pl
from jax.experimental.pallas import tpu as pltpu

LANE = 128
BM_TARGET = 2048  # target rows per tile (~1 MiB / input / tile at f32)


def _cdiv(a, b):
    return -(-a // b)


def _loss_sums_kernel(qtl_ref, vlt_o_ref, vlt_t_ref, sf_o_ref, sf_t_ref,
                      out_ref, tgt_ref, sums_ref, acc_q, acc_m, acc_s):
    i = pl.program_id(0)

    @pl.when(i == 0)
    def _init():
        acc_q[...] = jnp.zeros_like(acc_q)
        acc_m[...] = jnp.zeros_like(acc_m)
        acc_s[...] = jnp.zeros_like(acc_s)

    qtl = qtl_ref[0]
    f32 = jnp.float32

    # pinball / quantile term on (out - target):
    #   qtl*relu(-d) + (1-qtl)*relu(d) == 0.5*|d| + (0.5 - qtl)*d
    d = out_ref[...].astype(f32) - tgt_ref[...].astype(f32)
    qtl_loss = 0.5 * jnp.abs(d) + (0.5 - qtl) * d

    # MSE term on (vlt_o - vlt_t)
    dv = vlt_o_ref[...].astype(f32) - vlt_t_ref[...].astype(f32)
    mse = dv * dv

    # asymmetric 0.9 / 0.1 term: 0.9*relu(-d) + 0.1*relu(d) == 0.5*|d| - 0.4*d
    dsf = sf_o_ref[...].astype(f32) - sf_t_ref[...].astype(f32)
    sf_loss = 0.5 * jnp.abs(dsf) - 0.4 * dsf

    # Element-wise accumulation into (8, 128) f32 VMEM accumulators.
    # Reducing only over the leading (vreg-count) axis is plain VPU adds;
    # the expensive cross-lane reduction happens once in finalize.
    bm = d.shape[0]
    acc_q[...] += jnp.sum(qtl_loss.reshape(bm // 8, 8, LANE), axis=0)
    acc_m[...] += jnp.sum(mse.reshape(bm // 8, 8, LANE), axis=0)
    acc_s[...] += jnp.sum(sf_loss.reshape(bm // 8, 8, LANE), axis=0)

    @pl.when(i == pl.num_programs(0) - 1)
    def _finalize():
        sums_ref[0, 0] = jnp.sum(acc_q[...])
        sums_ref[0, 1] = jnp.sum(acc_m[...])
        sums_ref[0, 2] = jnp.sum(acc_s[...])


def e2e_loss(vlt_o, vlt_t, sf_o, sf_t, out, target, qtl=0.7,
             size_average=True, lmd_1=0.5, lmd_2=0.5):
    """Pallas implementation of E2E_loss.forward. Returns (qtl_loss, loss)."""
    arrays = (vlt_o, vlt_t, sf_o, sf_t, out, target)
    total = out.size
    assert all(a.size == total for a in arrays), "all inputs must match in size"

    # sublane multiple required by the narrowest dtype (f32->8, bf16->16, i8->32)
    sub = max(max(32 // jnp.dtype(a.dtype).itemsize for a in arrays), 8)

    rows = _cdiv(total, LANE)
    steps = max(1, _cdiv(rows, BM_TARGET))
    bm = _cdiv(_cdiv(rows, steps), sub) * sub        # rows per tile
    padded_rows = bm * steps
    padded_total = padded_rows * LANE

    def flat(x):
        x = x.reshape(-1)
        if padded_total != total:
            x = jnp.pad(x, (0, padded_total - total))  # zeros -> 0 contribution
        return x.reshape(padded_rows, LANE)

    qtl_arr = jnp.asarray([qtl], dtype=jnp.float32)    # runtime SMEM scalar

    tile_spec = pl.BlockSpec((bm, LANE), lambda i: (i, 0))
    sums = pl.pallas_call(
        _loss_sums_kernel,
        out_shape=jax.ShapeDtypeStruct((1, 3), jnp.float32),
        grid_spec=pltpu.PrefetchScalarGridSpec(
            num_scalar_prefetch=0,
            grid=(steps,),
            in_specs=[pl.BlockSpec(memory_space=pltpu.SMEM)] + [tile_spec] * 6,
            out_specs=pl.BlockSpec(memory_space=pltpu.SMEM),
            scratch_shapes=[pltpu.VMEM((8, LANE), jnp.float32)] * 3,
        ),
        compiler_params=pltpu.CompilerParams(
            dimension_semantics=("arbitrary",),
            vmem_limit_bytes=32 << 20,
        ),
    )(qtl_arr, *(flat(a) for a in arrays))
    # TODO(synk): on v7x, shard the row range across the 2 TensorCores (two
    # pallas_call shards, sum the (2,3) partials in JAX) to hit full HBM BW.

    nf = jnp.float32(total)
    qtl_sum, mse_sum, sf_sum = sums[0, 0], sums[0, 1], sums[0, 2]

    qtl_loss = qtl_sum / nf if size_average else qtl_sum
    sf_loss = sf_sum / nf if size_average else sf_sum
    vlt_loss = mse_sum / nf            # nn.MSELoss() default reduction = 'mean'

    loss = qtl_loss + lmd_1 * vlt_loss + lmd_2 * sf_loss
    return qtl_loss, loss


def _reference(vlt_o, vlt_t, sf_o, sf_t, out, target, qtl=0.7,
               lmd_1=0.5, lmd_2=0.5):
    f32 = jnp.float32
    d = out.astype(f32) - target.astype(f32)
    qtl_l = (qtl * jnp.maximum(-d, 0.0) + (1 - qtl) * jnp.maximum(d, 0.0)).mean()
    vlt_l = jnp.mean((vlt_o.astype(f32) - vlt_t.astype(f32)) ** 2)
    dsf = sf_o.astype(f32) - sf_t.astype(f32)
    sf_l = (0.9 * jnp.maximum(-dsf, 0.0) + 0.1 * jnp.maximum(dsf, 0.0)).mean()
    return qtl_l, qtl_l + lmd_1 * vlt_l + lmd_2 * sf_l


if __name__ == "__main__":
    key = jax.random.PRNGKey(0)

    def make(shape, dtype):
        ks = jax.random.split(key, 6)
        return tuple(
            jax.random.normal(k, shape, dtype=jnp.float32).astype(dtype)
            for k in ks
        )

    # 1) small f32 case (2, 4, 16, 16) -> (16, 128) slab
    args = make((2, 4, 16, 16), jnp.float32)
    got = e2e_loss(*args)
    jax.block_until_ready(got)
    ref = _reference(*args)
    assert jnp.allclose(got[0], ref[0], atol=1e-5, rtol=1e-5)
    assert jnp.allclose(got[1], ref[1], atol=1e-5, rtol=1e-5)

    # 2) ragged element count (105) exercises the zero-padding path + runtime qtl
    args = make((3, 5, 7), jnp.float32)
    got = e2e_loss(*args, qtl=0.3)
    jax.block_until_ready(got)
    ref = _reference(*args, qtl=0.3)
    assert jnp.allclose(got[0], ref[0], atol=1e-5, rtol=1e-5)
    assert jnp.allclose(got[1], ref[1], atol=1e-5, rtol=1e-5)

    # 3) bf16 inputs stream in native dtype; math is f32 inside the kernel
    args = make((2, 4, 16, 16), jnp.bfloat16)
    got = e2e_loss(*args)
    jax.block_until_ready(got)
    ref = _reference(*args)
    assert jnp.allclose(got[0], ref[0], atol=1e-4, rtol=1e-4)
    assert jnp.allclose(got[1], ref[1], atol=1e-4, rtol=1e-4)

    print("KERNEL_OK")
</pallas_src>

<mosaic_0001>
module attributes {stable_mosaic.version = 11 : i64} {
  func.func @_loss_sums_kernel(%arg0: i32, %arg1: memref<1xf32, #tpu.memory_space<smem>>, %arg2: memref<16x128xf32, #tpu.memory_space<vmem>>, %arg3: memref<16x128xf32, #tpu.memory_space<vmem>>, %arg4: memref<16x128xf32, #tpu.memory_space<vmem>>, %arg5: memref<16x128xf32, #tpu.memory_space<vmem>>, %arg6: memref<16x128xf32, #tpu.memory_space<vmem>>, %arg7: memref<16x128xf32, #tpu.memory_space<vmem>>, %arg8: memref<1x3xf32, #tpu.memory_space<smem>>, %arg9: memref<8x128xf32, #tpu.memory_space<vmem>>, %arg10: memref<8x128xf32, #tpu.memory_space<vmem>>, %arg11: memref<8x128xf32, #tpu.memory_space<vmem>>) attributes {dimension_semantics = [#tpu.dimension_semantics<arbitrary>], iteration_bounds = array<i64: 1>, scalar_prefetch = 0 : i64, scratch_operands = 3 : i64, tpu.core_type = #tpu.core_type<tc>, window_params = [{transform_indices = @transform_0, window_bounds = array<i64: 1>}, {transform_indices = @transform_1, window_bounds = array<i64: 16, 128>}, {transform_indices = @transform_2, window_bounds = array<i64: 16, 128>}, {transform_indices = @transform_3, window_bounds = array<i64: 16, 128>}, {transform_indices = @transform_4, window_bounds = array<i64: 16, 128>}, {transform_indices = @transform_5, window_bounds = array<i64: 16, 128>}, {transform_indices = @transform_6, window_bounds = array<i64: 16, 128>}, {transform_indices = @transform_7, window_bounds = array<i64: 1, 3>}]} {
    %c0_i32 = arith.constant 0 : i32
    %0 = arith.cmpi eq, %arg0, %c0_i32 : i32
    %1 = arith.extui %0 : i1 to i32
    %c0_i32_0 = arith.constant 0 : i32
    %2 = arith.cmpi ne, %1, %c0_i32_0 : i32
    scf.if %2 {
      %cst_33 = arith.constant 0.000000e+00 : f32
      %45 = vector.broadcast %cst_33 : f32 to vector<8x128xf32>
      %c0_34 = arith.constant 0 : index
      %c0_35 = arith.constant 0 : index
      %46 = vector.load %arg9[%c0_34, %c0_35] : memref<8x128xf32, #tpu.memory_space<vmem>>, vector<8x128xf32>
      tpu.vector_store %arg9[%c0_34, %c0_35], %45 {strides = array<i32>} : memref<8x128xf32, #tpu.memory_space<vmem>>, vector<8x128xf32>,
      %cst_36 = arith.constant 0.000000e+00 : f32
      %47 = vector.broadcast %cst_36 : f32 to vector<8x128xf32>
      %c0_37 = arith.constant 0 : index
      %c0_38 = arith.constant 0 : index
      %48 = vector.load %arg10[%c0_37, %c0_38] : memref<8x128xf32, #tpu.memory_space<vmem>>, vector<8x128xf32>
      tpu.vector_store %arg10[%c0_37, %c0_38], %47 {strides = array<i32>} : memref<8x128xf32, #tpu.memory_space<vmem>>, vector<8x128xf32>,
      %cst_39 = arith.constant 0.000000e+00 : f32
      %49 = vector.broadcast %cst_39 : f32 to vector<8x128xf32>
      %c0_40 = arith.constant 0 : index
      %c0_41 = arith.constant 0 : index
      %50 = vector.load %arg11[%c0_40, %c0_41] : memref<8x128xf32, #tpu.memory_space<vmem>>, vector<8x128xf32>
      tpu.vector_store %arg11[%c0_40, %c0_41], %49 {strides = array<i32>} : memref<8x128xf32, #tpu.memory_space<vmem>>, vector<8x128xf32>,
    } else {
    }
    %c0 = arith.constant 0 : index
    %3 = memref.load %arg1[%c0] : memref<1xf32, #tpu.memory_space<smem>>
    %c0_1 = arith.constant 0 : index
    %c0_2 = arith.constant 0 : index
    %4 = vector.load %arg6[%c0_1, %c0_2] : memref<16x128xf32, #tpu.memory_space<vmem>>, vector<16x128xf32>
    %c0_3 = arith.constant 0 : index
    %c0_4 = arith.constant 0 : index
    %5 = vector.load %arg7[%c0_3, %c0_4] : memref<16x128xf32, #tpu.memory_space<vmem>>, vector<16x128xf32>
    %6 = arith.subf %4, %5 : vector<16x128xf32>
    %7 = math.absf %6 : vector<16x128xf32>
    %cst = arith.constant 5.000000e-01 : f32
    %8 = vector.broadcast %cst : f32 to vector<16x128xf32>
    %9 = arith.mulf %8, %7 : vector<16x128xf32>
    %cst_5 = arith.constant 5.000000e-01 : f32
    %10 = arith.subf %cst_5, %3 : f32
    %11 = vector.broadcast %10 : f32 to vector<16x128xf32>
    %12 = arith.mulf %11, %6 : vector<16x128xf32>
    %13 = arith.addf %9, %12 : vector<16x128xf32>
    %c0_6 = arith.constant 0 : index
    %c0_7 = arith.constant 0 : index
    %14 = vector.load %arg2[%c0_6, %c0_7] : memref<16x128xf32, #tpu.memory_space<vmem>>, vector<16x128xf32>
    %c0_8 = arith.constant 0 : index
    %c0_9 = arith.constant 0 : index
    %15 = vector.load %arg3[%c0_8, %c0_9] : memref<16x128xf32, #tpu.memory_space<vmem>>, vector<16x128xf32>
    %16 = arith.subf %14, %15 : vector<16x128xf32>
    %17 = arith.mulf %16, %16 : vector<16x128xf32>
    %c0_10 = arith.constant 0 : index
    %c0_11 = arith.constant 0 : index
    %18 = vector.load %arg4[%c0_10, %c0_11] : memref<16x128xf32, #tpu.memory_space<vmem>>, vector<16x128xf32>
    %c0_12 = arith.constant 0 : index
    %c0_13 = arith.constant 0 : index
    %19 = vector.load %arg5[%c0_12, %c0_13] : memref<16x128xf32, #tpu.memory_space<vmem>>, vector<16x128xf32>
    %20 = arith.subf %18, %19 : vector<16x128xf32>
    %21 = math.absf %20 : vector<16x128xf32>
    %cst_14 = arith.constant 5.000000e-01 : f32
    %22 = vector.broadcast %cst_14 : f32 to vector<16x128xf32>
    %23 = arith.mulf %22, %21 : vector<16x128xf32>
    %cst_15 = arith.constant 4.000000e-01 : f32
    %24 = vector.broadcast %cst_15 : f32 to vector<16x128xf32>
    %25 = arith.mulf %24, %20 : vector<16x128xf32>
    %26 = arith.subf %23, %25 : vector<16x128xf32>
    %c0_16 = arith.constant 0 : index
    %c0_17 = arith.constant 0 : index
    %27 = vector.load %arg9[%c0_16, %c0_17] : memref<8x128xf32, #tpu.memory_space<vmem>>, vector<8x128xf32>
    %28 = vector.shape_cast %13 : vector<16x128xf32> to vector<2x8x128xf32>
    %cst_18 = arith.constant dense<0.000000e+00> : vector<8x128xf32>
    %29 = vector.multi_reduction <add>, %28, %cst_18 [0] : vector<2x8x128xf32> to vector<8x128xf32>
    %30 = arith.addf %27, %29 : vector<8x128xf32>
    %c0_19 = arith.constant 0 : index
    %c0_20 = arith.constant 0 : index
    %31 = vector.load %arg9[%c0_19, %c0_20] : memref<8x128xf32, #tpu.memory_space<vmem>>, vector<8x128xf32>
    tpu.vector_store %arg9[%c0_19, %c0_20], %30 {strides = array<i32>} : memref<8x128xf32, #tpu.memory_space<vmem>>, vector<8x128xf32>,
    %c0_21 = arith.constant 0 : index
    %c0_22 = arith.constant 0 : index
    %32 = vector.load %arg10[%c0_21, %c0_22] : memref<8x128xf32, #tpu.memory_space<vmem>>, vector<8x128xf32>
    %33 = vector.shape_cast %17 : vector<16x128xf32> to vector<2x8x128xf32>
    %cst_23 = arith.constant dense<0.000000e+00> : vector<8x128xf32>
    %34 = vector.multi_reduction <add>, %33, %cst_23 [0] : vector<2x8x128xf32> to vector<8x128xf32>
    %35 = arith.addf %32, %34 : vector<8x128xf32>
    %c0_24 = arith.constant 0 : index
    %c0_25 = arith.constant 0 : index
    %36 = vector.load %arg10[%c0_24, %c0_25] : memref<8x128xf32, #tpu.memory_space<vmem>>, vector<8x128xf32>
    tpu.vector_store %arg10[%c0_24, %c0_25], %35 {strides = array<i32>} : memref<8x128xf32, #tpu.memory_space<vmem>>, vector<8x128xf32>,
    %c0_26 = arith.constant 0 : index
    %c0_27 = arith.constant 0 : index
    %37 = vector.load %arg11[%c0_26, %c0_27] : memref<8x128xf32, #tpu.memory_space<vmem>>, vector<8x128xf32>
    %38 = vector.shape_cast %26 : vector<16x128xf32> to vector<2x8x128xf32>
    %cst_28 = arith.constant dense<0.000000e+00> : vector<8x128xf32>
    %39 = vector.multi_reduction <add>, %38, %cst_28 [0] : vector<2x8x128xf32> to vector<8x128xf32>
    %40 = arith.addf %37, %39 : vector<8x128xf32>
    %c0_29 = arith.constant 0 : index
    %c0_30 = arith.constant 0 : index
    %41 = vector.load %arg11[%c0_29, %c0_30] : memref<8x128xf32, #tpu.memory_space<vmem>>, vector<8x128xf32>
    tpu.vector_store %arg11[%c0_29, %c0_30], %40 {strides = array<i32>} : memref<8x128xf32, #tpu.memory_space<vmem>>, vector<8x128xf32>,
    %c0_i32_31 = arith.constant 0 : i32
    %42 = arith.cmpi eq, %arg0, %c0_i32_31 : i32
    %43 = arith.extui %42 : i1 to i32
    %c0_i32_32 = arith.constant 0 : i32
    %44 = arith.cmpi ne, %43, %c0_i32_32 : i32
    scf.if %44 {
      %c0_33 = arith.constant 0 : index
      %c0_34 = arith.constant 0 : index
      %45 = vector.load %arg9[%c0_33, %c0_34] : memref<8x128xf32, #tpu.memory_space<vmem>>, vector<8x128xf32>
      %46 = vector.shape_cast %45 : vector<8x128xf32> to vector<1x8x128xf32>
      %cst_35 = arith.constant dense<0.000000e+00> : vector<1xf32>
      %47 = vector.multi_reduction <add>, %46, %cst_35 [1, 2] : vector<1x8x128xf32> to vector<1xf32>
      %48 = vector.shape_cast %47 : vector<1xf32> to vector<1x1x1xf32>
      %49 = vector.extract %48[0, 0, 0] : f32 from vector<1x1x1xf32>
      %c0_36 = arith.constant 0 : index
      %c0_37 = arith.constant 0 : index
      %50 = memref.load %arg8[%c0_36, %c0_37] : memref<1x3xf32, #tpu.memory_space<smem>>
      memref.store %49, %arg8[%c0_36, %c0_37] : memref<1x3xf32, #tpu.memory_space<smem>>
      %c0_38 = arith.constant 0 : index
      %c0_39 = arith.constant 0 : index
      %51 = vector.load %arg10[%c0_38, %c0_39] : memref<8x128xf32, #tpu.memory_space<vmem>>, vector<8x128xf32>
      %52 = vector.shape_cast %51 : vector<8x128xf32> to vector<1x8x128xf32>
      %cst_40 = arith.constant dense<0.000000e+00> : vector<1xf32>
      %53 = vector.multi_reduction <add>, %52, %cst_40 [1, 2] : vector<1x8x128xf32> to vector<1xf32>
      %54 = vector.shape_cast %53 : vector<1xf32> to vector<1x1x1xf32>
      %55 = vector.extract %54[0, 0, 0] : f32 from vector<1x1x1xf32>
      %c0_41 = arith.constant 0 : index
      %c1 = arith.constant 1 : index
      %56 = memref.load %arg8[%c0_41, %c1] : memref<1x3xf32, #tpu.memory_space<smem>>
      memref.store %55, %arg8[%c0_41, %c1] : memref<1x3xf32, #tpu.memory_space<smem>>
      %c0_42 = arith.constant 0 : index
      %c0_43 = arith.constant 0 : index
      %57 = vector.load %arg11[%c0_42, %c0_43] : memref<8x128xf32, #tpu.memory_space<vmem>>, vector<8x128xf32>
      %58 = vector.shape_cast %57 : vector<8x128xf32> to vector<1x8x128xf32>
      %cst_44 = arith.constant dense<0.000000e+00> : vector<1xf32>
      %59 = vector.multi_reduction <add>, %58, %cst_44 [1, 2] : vector<1x8x128xf32> to vector<1xf32>
      %60 = vector.shape_cast %59 : vector<1xf32> to vector<1x1x1xf32>
      %61 = vector.extract %60[0, 0, 0] : f32 from vector<1x1x1xf32>
      %c0_45 = arith.constant 0 : index
      %c2 = arith.constant 2 : index
      %62 = memref.load %arg8[%c0_45, %c2] : memref<1x3xf32, #tpu.memory_space<smem>>
      memref.store %61, %arg8[%c0_45, %c2] : memref<1x3xf32, #tpu.memory_space<smem>>
    } else {
    }
    return
  }
  func.func @transform_0(%arg0: i32) -> i32 {
    %c0_i32 = arith.constant 0 : i32
    %c0_i32_0 = arith.constant 0 : i32
    return %c0_i32 : i32
  }
  func.func @transform_1(%arg0: i32) -> (i32, i32) {
    %c0_i32 = arith.constant 0 : i32
    %c0_i32_0 = arith.constant 0 : i32
    return %arg0, %c0_i32 : i32, i32
  }
  func.func @transform_2(%arg0: i32) -> (i32, i32) {
    %c0_i32 = arith.constant 0 : i32
    %c0_i32_0 = arith.constant 0 : i32
    return %arg0, %c0_i32 : i32, i32
  }
  func.func @transform_3(%arg0: i32) -> (i32, i32) {
    %c0_i32 = arith.constant 0 : i32
    %c0_i32_0 = arith.constant 0 : i32
    return %arg0, %c0_i32 : i32, i32
  }
  func.func @transform_4(%arg0: i32) -> (i32, i32) {
    %c0_i32 = arith.constant 0 : i32
    %c0_i32_0 = arith.constant 0 : i32
    return %arg0, %c0_i32 : i32, i32
  }
  func.func @transform_5(%arg0: i32) -> (i32, i32) {
    %c0_i32 = arith.constant 0 : i32
    %c0_i32_0 = arith.constant 0 : i32
    return %arg0, %c0_i32 : i32, i32
  }
  func.func @transform_6(%arg0: i32) -> (i32, i32) {
    %c0_i32 = arith.constant 0 : i32
    %c0_i32_0 = arith.constant 0 : i32
    return %arg0, %c0_i32 : i32, i32
  }
  func.func @transform_7(%arg0: i32) -> (i32, i32) {
    %c0_i32 = arith.constant 0 : i32
    %c0_i32_0 = arith.constant 0 : i32
    %c0_i32_1 = arith.constant 0 : i32
    return %c0_i32, %c0_i32_0 : i32, i32
  }
}

</mosaic_0001>

<bundles_post_ra>
// kernel: tpu_custom_call.1
= control target key start
LH: loop header
LB: loop body
LE: loop exit
PB: predicated region body
PF: predicated region fallthrough
CT: control target
= control target key end

     0   :  { %13 = vsyncpa [#allocation7], 0  ;;  %s509_s0 = inlined_call_operand.<no memory space> [shape: f32[1], index: 0, kind: input, shape index: {}]   ;;  %s510_s1 = inlined_call_operand.hbm [shape: f32[16,128], index: 1, kind: input, shape index: {}]   ;;  %s511_s2 = inlined_call_operand.hbm [shape: f32[16,128], index: 2, kind: input, shape index: {}]   ;;  %s512_s3 = inlined_call_operand.hbm [shape: f32[16,128], index: 3, kind: input, shape index: {}]   ;;  %s513_s4 = inlined_call_operand.hbm [shape: f32[16,128], index: 4, kind: input, shape index: {}]   ;;  %s514_s5 = inlined_call_operand.vmem [shape: f32[16,128], index: 5, kind: input, shape index: {}]   ;;  %s515_s6 = inlined_call_operand.hbm [shape: f32[16,128], index: 6, kind: input, shape index: {}]   ;;  %s516_s7 = inlined_call_operand.hbm [shape: f32[1,3], index: 7, kind: output, shape index: {}]  }
   0x1   :  { %14 = vsyncpa [#allocation10], 0 }
   0x2   :  { %15 = vsyncpa [#allocation13], 0 }
   0x3   :  { %16 = vsyncpa [#allocation8], 0  ;;  %s351_s24 = smov [#allocation9]   ;;  %s352_s26 = smov [#allocation12]  }
   0x4   :  { %s36_s25 = sshll.u32 %s351_s24, 4  ;;  %s60_s27 = sshll.u32 %s352_s26, 4  ;;  %s37_s25 = int_to_ptr.vmem [resolvable:$true] %s36_s25  ;;  %s399_s27 = int_to_ptr.vmem [resolvable:$true] %s60_s27 }
   0x5   :  { %s223_s30 = scalar_lea.hbm %s511_s2, 256 }
   0x6   :  { %p224_p0 = scmp.ne.s32.totalorder %s511_s2, %s223_s30  ;;  %p227_p1 = scmp.lt.u32.totalorder %s223_s30, %s511_s2 }
   0x8   :  { %p229_p2 = pnand %p227_p1, %p224_p0 }
   0xa   :  { %232 = shalt.err (!%p229_p2)
}
   0xb   :  { %s233_s12 = scalar_lea.vmem %s37_s25, 256  ;;  %p238_p4 = scmp.lt.s32.totalorder %s37_s25, %s37_s25 }
   0xc   :  { %p234_p3 = scmp.ne.s32.totalorder %s37_s25, %s233_s12  ;;  %p239_p5 = scmp.lt.s32.totalorder %s233_s12, %s233_s12 }
   0xe   :  { %p240_p6 = por %p239_p5, %p238_p4 }
  0x10   :  { %p241_p7 = pnand %p240_p6, %p234_p3 }
  0x12   :  { %244 = shalt.err (!%p241_p7)
}
  0x13   :  { %s353_s13 = smov 128   ;;  %s354_s14 = smov 8  }
  0x14   :  { %42 = dma.hbm_to_vmem [thread:$0]  %s511_s2, 256, %s37_s25, [#allocation10], %s353_s13, %s353_s13, %s354_s14  }
  0x15   :  { %s245_s19 = scalar_lea.hbm %s513_s4, 256 }
  0x16   :  { %p246_p8 = scmp.ne.s32.totalorder %s513_s4, %s245_s19  ;;  %p249_p9 = scmp.lt.u32.totalorder %s245_s19, %s513_s4 }
  0x18   :  { %p251_p10 = pnand %p249_p9, %p246_p8 }
  0x1a   :  { %254 = shalt.err (!%p251_p10)
}
  0x1b   :  { %s255_s24 = scalar_lea.vmem %s399_s27, 256  ;;  %p260_p12 = scmp.lt.s32.totalorder %s399_s27, %s399_s27 }
  0x1c   :  { %p256_p11 = scmp.ne.s32.totalorder %s399_s27, %s255_s24  ;;  %p261_p13 = scmp.lt.s32.totalorder %s255_s24, %s255_s24 }
  0x1e   :  { %p262_p0 = por %p261_p13, %p260_p12 }
  0x20   :  { %p263_p1 = pnand %p262_p0, %p256_p11 }
  0x22   :  { %266 = shalt.err (!%p263_p1)
}
  0x23   :  { %66 = dma.hbm_to_vmem [thread:$0]  %s513_s4, 256, %s399_s27, [#allocation13], %s353_s13, %s353_s13, %s354_s14  }
  0x24   :  { %s355_s26 = smov [#allocation6]   ;;  %s356_s29 = smov [#allocation11]  }
  0x25   :  { %s24_s28 = sshll.u32 %s355_s26, 4  ;;  %s48_s30 = sshll.u32 %s356_s29, 4  ;;  %s25_s28 = int_to_ptr.vmem [resolvable:$true] %s24_s28  ;;  %s436_s30 = int_to_ptr.vmem [resolvable:$true] %s48_s30 }
  0x26   :  { %s267_s10 = scalar_lea.hbm %s510_s1, 256 }
  0x27   :  { %p268_p2 = scmp.ne.s32.totalorder %s510_s1, %s267_s10  ;;  %p271_p3 = scmp.lt.u32.totalorder %s267_s10, %s510_s1 }
  0x29   :  { %p273_p4 = pnand %p271_p3, %p268_p2 }
  0x2b   :  { %276 = shalt.err (!%p273_p4)
}
  0x2c   :  { %s277_s4 = scalar_lea.vmem %s25_s28, 256  ;;  %p282_p6 = scmp.lt.s32.totalorder %s25_s28, %s25_s28 }
  0x2d   :  { %p278_p5 = scmp.ne.s32.totalorder %s25_s28, %s277_s4  ;;  %p283_p7 = scmp.lt.s32.totalorder %s277_s4, %s277_s4 }
  0x2f   :  { %p284_p8 = por %p283_p7, %p282_p6 }
  0x31   :  { %p285_p9 = pnand %p284_p8, %p278_p5 }
  0x33   :  { %288 = shalt.err (!%p285_p9)
}
  0x34   :  { %30 = dma.hbm_to_vmem [thread:$0]  %s510_s1, 256, %s25_s28, [#allocation7], %s353_s13, %s353_s13, %s354_s14  }
  0x35   :  { %s289_s20 = scalar_lea.hbm %s512_s3, 256 }
  0x36   :  { %p290_p10 = scmp.ne.s32.totalorder %s512_s3, %s289_s20  ;;  %p293_p11 = scmp.lt.u32.totalorder %s289_s20, %s512_s3 }
  0x38   :  { %p295_p12 = pnand %p293_p11, %p290_p10 }
  0x3a   :  { %298 = shalt.err (!%p295_p12)
}
  0x3b   :  { %s299_s2 = scalar_lea.vmem %s436_s30, 256  ;;  %p304_p0 = scmp.lt.s32.totalorder %s436_s30, %s436_s30 }
  0x3c   :  { %p300_p13 = scmp.ne.s32.totalorder %s436_s30, %s299_s2  ;;  %p305_p1 = scmp.lt.s32.totalorder %s299_s2, %s299_s2 }
  0x3e   :  { %p306_p2 = por %p305_p1, %p304_p0 }
  0x40   :  { %p307_p3 = pnand %p306_p2, %p300_p13 }
  0x42   :  { %310 = shalt.err (!%p307_p3)
}
  0x43   :  { %54 = dma.hbm_to_vmem [thread:$0]  %s512_s3, 256, %s436_s30, [#allocation10], %s353_s13, %s353_s13, %s354_s14  }
  0x44   :  { %s357_s26 = smov [#allocation14]   ;;  %s311_s9 = scalar_lea.hbm %s515_s6, 256 }
  0x45   :  { %s74_s28 = sshll.u32 %s357_s26, 4  ;;  %p312_p4 = scmp.ne.s32.totalorder %s515_s6, %s311_s9  ;;  %s75_s28 = int_to_ptr.vmem [resolvable:$true] %s74_s28 }
  0x46   :  { %p315_p5 = scmp.lt.u32.totalorder %s311_s9, %s515_s6 }
  0x48   :  { %p317_p6 = pnand %p315_p5, %p312_p4 }
  0x4a   :  { %320 = shalt.err (!%p317_p6)
}
  0x4b   :  { %s321_s16 = scalar_lea.vmem %s75_s28, 256  ;;  %p326_p8 = scmp.lt.s32.totalorder %s75_s28, %s75_s28 }
  0x4c   :  { %p322_p7 = scmp.ne.s32.totalorder %s75_s28, %s321_s16  ;;  %p327_p9 = scmp.lt.s32.totalorder %s321_s16, %s321_s16 }
  0x4e   :  { %p328_p10 = por %p327_p9, %p326_p8 }
  0x50   :  { %p329_p11 = pnand %p328_p10, %p322_p7 }
  0x52   :  { %332 = shalt.err (!%p329_p11)
}
  0x53   :  { %80 = dma.hbm_to_vmem [thread:$0]  %s515_s6, 256, %s75_s28, [#allocation13], %s353_s13, %s353_s13, %s354_s14  }
  0x54   :  { %343 = dma.done.wait [#allocation7], 256  }
  0x55   :  { %344 = vsyncadd [#allocation7], 4294967040 }
  0x56   :  { %345 = dma.done.wait [#allocation10], 512  }
  0x57   :  { %346 = vsyncadd [#allocation10], 4294966784 }
  0x58   :  { %347 = dma.done.wait [#allocation13], 512  }
  0x59   :  { %348 = vsyncadd [#allocation13], 4294966784  ;;  %s114_s17 = ssub.f32 0.5, %s509_s0  ;;  %v128_v0 = vld [vmem:[#allocation11] sm:$0xff]  ;;  %v129_v1 = vld [vmem:[#allocation11 + $0x8] sm:$0xff]  ;;  %s333_s22 = scalar_lea.hbm %s516_s7, 16 }
  0x5a   :  { %v130_v2 = vld [vmem:[#allocation12] sm:$0xff]  ;;  %v131_v3 = vld [vmem:[#allocation12 + $0x8] sm:$0xff]  ;;  %v104_v5 = vld [vmem:[%s514_s5] sm:$0xff]  ;;  %p334_p12 = scmp.ne.s32.totalorder %s516_s7, %s333_s22  ;;  %p337_p13 = scmp.lt.u32.totalorder %s333_s22, %s516_s7 }
  0x5b   :  { %v132_v4 = vsub.f32 %v128_v0, %v130_v2  ;;  %v105_v6 = vld [vmem:[%s514_s5 + $0x8] sm:$0xff]  ;;  %v133_v7 = vsub.f32 %v129_v1, %v131_v3  ;;  %v106_v8 = vld [vmem:[#allocation14] sm:$0xff]  ;;  %v115_v10 = vstv %s114_s17  ;;  %v122_v17 = vld [vmem:[#allocation9] sm:$0xff] }
  0x5c   :  { %v107_v9 = vld [vmem:[#allocation14 + $0x8] sm:$0xff]  ;;  %v120_v11 = vld [vmem:[#allocation6] sm:$0xff]  ;;  %v108_v14 = vsub.f32 %v104_v5, %v106_v8  ;;  %v123_v20 = vld [vmem:[#allocation9 + $0x8] sm:$0xff]  ;;  %p339_p0 = pnand %p337_p13, %p334_p12 }
  0x5d   :  { %v134_v12 = vand.u32 2147483647, %v132_v4  ;;  %v138_v13 = vmul.f32 0.4, %v132_v4  ;;  %v109_v15 = vsub.f32 %v105_v6, %v107_v9  ;;  %v121_v16 = vld [vmem:[#allocation6 + $0x8] sm:$0xff]  ;;  %v124_v21 = vsub.f32 %v120_v11, %v122_v17 }
  0x5e   :  { %v135_v18 = vand.u32 2147483647, %v133_v7  ;;  %v139_v19 = vmul.f32 0.4, %v133_v7  ;;  %v110_v23 = vand.u32 2147483647, %v108_v14  ;;  %v116_v25 = vmul.f32 %v115_v10, %v108_v14 }
  0x5f   :  { %v136_v22 = vmul.f32 0.5, %v134_v12  ;;  %v111_v24 = vand.u32 2147483647, %v109_v15  ;;  %v117_v27 = vmul.f32 %v115_v10, %v109_v15  ;;  %v125_v28 = vsub.f32 %v121_v16, %v123_v20 }
  0x60   :  { %v137_v26 = vmul.f32 0.5, %v135_v18  ;;  %v112_v30 = vmul.f32 0.5, %v110_v23  ;;  %v126_v35 = vmul.f32 %v124_v21, %v124_v21 }
  0x61   :  { %v140_v29 = vsub.f32 %v136_v22, %v138_v13  ;;  %v113_v31 = vmul.f32 0.5, %v111_v24  ;;  %v127_v36 = vmul.f32 %v125_v28, %v125_v28 }
  0x62   :  { %v141_v32 = vsub.f32 %v137_v26, %v139_v19  ;;  %v118_v33 = vadd.f32 %v116_v25, %v112_v30 }
  0x63   :  { %v119_v34 = vadd.f32 %v117_v27, %v113_v31  ;;  %v147_v39 = vadd.f32 %v127_v36, %v126_v35 }
  0x64   :  { %v151_v37 = vadd.f32 %v141_v32, %v140_v29 }
  0x65   :  { %v143_v38 = vadd.f32 %v119_v34, %v118_v33 }
  0x66   :  { %182 = vadd.xlane.f32.xlu1 %v151_v37 }
  0x67   :  { %158 = vadd.xlane.f32.xlu0 %v143_v38 }
  0x6b   :  { %170 = vadd.xlane.f32.xlu0 %v147_v39 }
  0xf3   :  { %v183_v40 = vpop.xlane.xlu1 %182 }
  0xf4   :  { %v184_v41 = vrot.slane %v183_v40, 4  ;;  %v159_v42 = vpop.xlane.xlu0 %158 }
  0xf5   :  { %v160_v43 = vrot.slane %v159_v42, 4 }
  0xf6   :  { %v185_v44 = vadd.f32 %v184_v41, %v183_v40 }
  0xf7   :  { %v161_v45 = vadd.f32 %v160_v43, %v159_v42 }
  0xf8   :  { %v186_v46 = vrot.slane %v185_v44, 2  ;;  %v171_v47 = vpop.xlane.xlu0 %170 }
  0xf9   :  { %v162_v48 = vrot.slane %v161_v45, 2  ;;  %v172_v49 = vrot.slane %v171_v47, 4 }
  0xfa   :  { %v187_v52 = vadd.f32 %v186_v46, %v185_v44 }
  0xfb   :  { %v173_v50 = vadd.f32 %v172_v49, %v171_v47  ;;  %v163_v51 = vadd.f32 %v162_v48, %v161_v45 }
  0xfc   :  { %v188_v57 = vrot.slane %v187_v52, 1 }
  0xfd   :  { %v174_v53 = vrot.slane %v173_v50, 2  ;;  %v164_v54 = vrot.slane %v163_v51, 1 }
  0xfe   :  { %v189_v60 = vadd.f32 %v188_v57, %v187_v52 }
  0xff   :  { %v175_v55 = vadd.f32 %v174_v53, %v173_v50  ;;  %v165_v56 = vadd.f32 %v164_v54, %v163_v51 }
 0x101   :  { %209 = vpush %v165_v56  ;;  %v176_v58 = vrot.slane %v175_v55, 1 }
 0x103   :  { %v177_v59 = vadd.f32 %v176_v58, %v175_v55 }
 0x105   :  { %211 = vpush %v177_v59 }
 0x106   :  { %213 = vpush %v189_v60 }
 0x132   :  { %s210_s0 = spop %209 }
 0x133   :  { %168 = sst [smem:[#allocation15]] %s210_s0 }
 0x136   :  { %s212_s5 = spop %211 }
 0x137   :  { %180 = sst [smem:[#allocation15 + $0x1]] %s212_s5  ;;  %s214_s14 = spop %213 }
 0x138   :  { %192 = sst [smem:[#allocation15 + $0x2]] %s214_s14 }
 0x139   :  { %342 = shalt.err (!%p339_p0)
}
 0x13a   :  { %s358_s25 = smov [#allocation15]  }
 0x13b   :  { %200 = dma.smem_to_hbm %s358_s25, 16, %s516_s7, [#allocation8]  }
 0x13c   :  { %349 = dma.done.wait [#allocation8], 16  }
 0x13d   :  { %350 = vsyncadd [#allocation8], 4294967280 }
 0x13e   :  { %204 = sfence }
 0x13f   :  { %205 = vsyncpa [#allocation7], 1 }
 0x140   :  { %206 = vsyncpa [#allocation10], 1 }
 0x141   :  { %207 = vsyncpa [#allocation13], 1 }
 0x142   :  { %208 = vsyncpa [#allocation8], 1 }

</bundles_post_ra>
